<compile_context>
chip_gen: v7x
topology: tpu7x:2x2x1
jax: 0.10.0
libtpu: 0.0.40
codegen_flags: <defaults>
</compile_context>

<pallas_src>
import jax
import jax.numpy as jnp
from jax.experimental import pallas as pl
from jax.experimental.pallas import tpu as pltpu


def _hswish_kernel(x_ref, o_ref):
    x = x_ref[...]
    # relu6(x + 3) == clip(x + 3, 0, 6); divide by 6.0 to match PyTorch exactly.
    relu6 = jnp.clip(x + 3.0, 0.0, 6.0)
    o_ref[...] = ((x * relu6) / 6.0).astype(o_ref.dtype)


def _pick_lanes(n, sub):
    """Pick a lane width (multiple of 128) that divides n, preferring layouts
    with at least `sub` rows. Falls back to 128 + tail pad for awkward sizes."""
    candidates = (512, 256, 128)
    for lanes in candidates:
        if n % lanes == 0 and n // lanes >= sub:
            return lanes, False
    for lanes in candidates:
        if n % lanes == 0:
            return lanes, False
    return 128, True


def hswish(x, *, target_block_bytes=4 * 1024 * 1024, donate=False):
    """Elementwise HSwish on an arbitrary-shaped array via a Pallas TPU kernel.

    target_block_bytes: approx bytes per grid-step block (per array).
        Default 4 MiB -> double-buffered in+out = 16 MiB, which fits the
        raised 32 MiB scoped-VMEM limit on every generation and sits in the
        HBM-roofline-saturating 2-4 MiB range on v6e/v7x.
    donate: if True (and no tail pad is needed), alias the input buffer to
        the output (caller must be able to donate x).
    """
    orig_shape = x.shape
    dtype = x.dtype
    n = x.size
    if n == 0:
        return x

    itemsize = jnp.dtype(dtype).itemsize
    # Dtype-aware minimum sublane multiple: f32 -> 8, bf16 -> 16, int8/fp8 -> 32.
    sub = {4: 8, 2: 16, 1: 32}.get(itemsize, 8)

    lanes, need_pad = _pick_lanes(n, sub)

    x_flat = x.reshape(-1)
    if need_pad:
        # Only for sizes not divisible by 128: pad the <lanes-element tail.
        padded_n = pl.cdiv(n, lanes) * lanes
        x_flat = jnp.pad(x_flat, (0, padded_n - n))
    else:
        padded_n = n
    rows = padded_n // lanes
    x2d = x_flat.reshape(rows, lanes)

    # Row tile: byte-constant blocks, rounded to the sublane multiple, never
    # padded up — the partial last block is masked by Pallas (safe for a pure
    # elementwise op: padded-region reads are garbage but their writes are
    # dropped).
    if rows <= sub:
        tr = rows  # block dim equals full array dim -> always legal
    else:
        bytes_per_row = lanes * itemsize
        tr = max(target_block_bytes // bytes_per_row, sub)
        tr = (tr // sub) * sub
        max_tr = (rows // sub) * sub  # largest sublane multiple <= rows
        tr = min(tr, max_tr)
        # Guarantee >=2 grid blocks when possible so both v7x TensorCores
        # stream (no effect on v5e/v6e single-TC chips).
        if pl.cdiv(rows, tr) < 2:
            half = ((rows + 1) // 2 + sub - 1) // sub * sub
            half = min(half, max_tr)
            if pl.cdiv(rows, half) >= 2:
                tr = half
    grid = (pl.cdiv(rows, tr),)

    cost = pl.CostEstimate(
        flops=5 * n,
        transcendentals=0,
        bytes_accessed=2 * n * itemsize,
    )

    call_kwargs = {}
    if donate and not need_pad:
        call_kwargs["input_output_aliases"] = {0: 0}

    out2d = pl.pallas_call(
        _hswish_kernel,
        out_shape=jax.ShapeDtypeStruct((rows, lanes), dtype),
        grid_spec=pltpu.PrefetchScalarGridSpec(
            num_scalar_prefetch=0,
            grid=grid,
            in_specs=[pl.BlockSpec((tr, lanes), lambda i: (i, 0))],
            out_specs=pl.BlockSpec((tr, lanes), lambda i: (i, 0)),
        ),
        compiler_params=pltpu.CompilerParams(
            dimension_semantics=("parallel",),
            vmem_limit_bytes=32 * 1024 * 1024,
        ),
        cost_estimate=cost,
        **call_kwargs,
    )(x2d)

    out_flat = out2d.reshape(-1)
    if need_pad:
        out_flat = out_flat[:n]
    return out_flat.reshape(orig_shape)


def _hswish_ref(x):
    return x * jnp.clip(x + 3.0, 0.0, 6.0) / 6.0


if __name__ == "__main__":
    key = jax.random.PRNGKey(0)

    # NCHW, like a PyTorch conv feature map.
    x = jax.random.normal(key, (2, 4, 16, 16), dtype=jnp.float32)
    y = hswish(x)
    jax.block_until_ready(y)
    assert y.shape == x.shape and y.dtype == x.dtype
    assert jnp.max(jnp.abs(y - _hswish_ref(x))) < 1e-6

    # Second small check exercising the partial last row-block (rows % tr != 0).
    x2 = jax.random.normal(jax.random.PRNGKey(0), (3, 4, 40, 128),
                           dtype=jnp.float32)
    y2 = hswish(x2)
    jax.block_until_ready(y2)
    assert jnp.max(jnp.abs(y2 - _hswish_ref(x2))) < 1e-6

    print("KERNEL_OK")
</pallas_src>

<mosaic_0001>
module attributes {stable_mosaic.version = 11 : i64} {
  func.func @_hswish_kernel(%arg0: i32, %arg1: memref<8x256xf32, #tpu.memory_space<vmem>>, %arg2: memref<8x256xf32, #tpu.memory_space<vmem>>) attributes {dimension_semantics = [#tpu.dimension_semantics<parallel>], iteration_bounds = array<i64: 1>, scalar_prefetch = 0 : i64, scratch_operands = 0 : i64, tpu.core_type = #tpu.core_type<tc>, window_params = [{transform_indices = @transform_0, window_bounds = array<i64: 8, 256>}, {transform_indices = @transform_1, window_bounds = array<i64: 8, 256>}]} {
    %c0 = arith.constant 0 : index
    %c0_0 = arith.constant 0 : index
    %0 = vector.load %arg1[%c0, %c0_0] : memref<8x256xf32, #tpu.memory_space<vmem>>, vector<8x256xf32>
    %cst = arith.constant 3.000000e+00 : f32
    %1 = vector.broadcast %cst : f32 to vector<8x256xf32>
    %2 = arith.addf %0, %1 : vector<8x256xf32>
    %cst_1 = arith.constant 0.000000e+00 : f32
    %cst_2 = arith.constant 6.000000e+00 : f32
    %3 = vector.broadcast %cst_1 : f32 to vector<8x256xf32>
    %4 = arith.maximumf %3, %2 : vector<8x256xf32>
    %5 = vector.broadcast %cst_2 : f32 to vector<8x256xf32>
    %6 = arith.minimumf %5, %4 : vector<8x256xf32>
    %7 = arith.mulf %0, %6 : vector<8x256xf32>
    %cst_3 = arith.constant 6.000000e+00 : f32
    %8 = vector.broadcast %cst_3 : f32 to vector<8x256xf32>
    %9 = arith.divf %7, %8 : vector<8x256xf32>
    %c0_4 = arith.constant 0 : index
    %c0_5 = arith.constant 0 : index
    %10 = vector.load %arg2[%c0_4, %c0_5] : memref<8x256xf32, #tpu.memory_space<vmem>>, vector<8x256xf32>
    tpu.vector_store %arg2[%c0_4, %c0_5], %9 {strides = array<i32>} : memref<8x256xf32, #tpu.memory_space<vmem>>, vector<8x256xf32>,
    return
  }
  func.func @transform_0(%arg0: i32) -> (i32, i32) {
    %c0_i32 = arith.constant 0 : i32
    %c0_i32_0 = arith.constant 0 : i32
    return %arg0, %c0_i32 : i32, i32
  }
  func.func @transform_1(%arg0: i32) -> (i32, i32) {
    %c0_i32 = arith.constant 0 : i32
    %c0_i32_0 = arith.constant 0 : i32
    return %arg0, %c0_i32 : i32, i32
  }
}

</mosaic_0001>

<bundles_post_ra>
// kernel: tpu_custom_call.1
= control target key start
LH: loop header
LB: loop body
LE: loop exit
PB: predicated region body
PF: predicated region fallthrough
CT: control target
= control target key end

     0   :  { %6 = vsyncpa [#allocation3], 0  ;;  %s137_s0 = inlined_call_operand.hbm [shape: f32[8,256], index: 0, kind: input, shape index: {}]   ;;  %s138_s1 = inlined_call_operand.hbm [shape: f32[8,256], index: 1, kind: output, shape index: {}]  }
   0x1   :  { %7 = vsyncpa [#allocation4], 0  ;;  %s101_s6 = smov [#allocation2]   ;;  %s53_s10 = scalar_lea.hbm %s137_s0, 256 }
   0x2   :  { %s14_s7 = sshll.u32 %s101_s6, 4  ;;  %p54_p0 = scmp.ne.s32.totalorder %s137_s0, %s53_s10  ;;  %s15_s7 = int_to_ptr.vmem [resolvable:$true] %s14_s7 }
   0x3   :  { %p57_p1 = scmp.lt.u32.totalorder %s53_s10, %s137_s0 }
   0x5   :  { %p59_p2 = pnand %p57_p1, %p54_p0 }
   0x7   :  { %62 = shalt.err (!%p59_p2)
}
   0x8   :  { %s63_s15 = scalar_lea.vmem %s15_s7, 256  ;;  %p68_p4 = scmp.lt.s32.totalorder %s15_s7, %s15_s7 }
   0x9   :  { %p64_p3 = scmp.ne.s32.totalorder %s15_s7, %s63_s15  ;;  %p69_p5 = scmp.lt.s32.totalorder %s63_s15, %s63_s15 }
   0xb   :  { %p70_p6 = por %p69_p5, %p68_p4 }
   0xd   :  { %p71_p7 = pnand %p70_p6, %p64_p3 }
   0xf   :  { %74 = shalt.err (!%p71_p7)
}
  0x10   :  { %17 = dma.hbm_to_vmem [thread:$0]  %s137_s0, 256, %s15_s7, [#allocation3]  }
  0x11   :  { %97 = dma.done.wait [#allocation3], 256  }
  0x12   :  { %98 = vsyncadd [#allocation3], 4294967040  ;;  %v21_v0 = vld [vmem:[#allocation2] sm:$0xff]  ;;  %v22_v1 = vld [vmem:[#allocation2 + $0x8] sm:$0xff]  ;;  %s102_s18 = smov [#allocation5]  }
  0x13   :  { %v23_v2 = vadd.f32 3.0, %v21_v0  ;;  %v24_v3 = vadd.f32 3.0, %v22_v1  ;;  %s42_s19 = sshll.u32 %s102_s18, 4  ;;  %s43_s19 = int_to_ptr.vmem [resolvable:$true] %s42_s19 }
  0x14   :  { %s75_s0 = scalar_lea.vmem %s43_s19, 256  ;;  %p80_p9 = scmp.lt.s32.totalorder %s43_s19, %s43_s19 }
  0x15   :  { %v25_v4 = vmax.f32 %v23_v2, 0.0  ;;  %v26_v5 = vmax.f32 %v24_v3, 0.0  ;;  %p76_p8 = scmp.ne.s32.totalorder %s43_s19, %s75_s0  ;;  %p81_p10 = scmp.lt.s32.totalorder %s75_s0, %s75_s0 }
  0x17   :  { %v27_v6 = vmin.f32 %v25_v4, 6.0  ;;  %v28_v7 = vmin.f32 %v26_v5, 6.0  ;;  %p82_p11 = por %p81_p10, %p80_p9 }
  0x19   :  { %v29_v8 = vmul.f32 %v27_v6, %v21_v0  ;;  %v30_v9 = vmul.f32 %v28_v7, %v22_v1  ;;  %p83_p12 = pnand %p82_p11, %p76_p8 }
  0x1b   :  { %v32_v10 = vmul.f32 0.16666667, %v29_v8  ;;  %v33_v11 = vmul.f32 0.16666667, %v30_v9 }
  0x1d   :  { %34 = vst [vmem:[#allocation5] sm:$0xff] %v32_v10  ;;  %35 = vst [vmem:[#allocation5 + $0x8] sm:$0xff] %v33_v11 }
  0x1e   :  { %86 = shalt.err (!%p83_p12)
}
  0x1f   :  { %s87_s22 = scalar_lea.hbm %s138_s1, 256 }
  0x20   :  { %p88_p13 = scmp.ne.s32.totalorder %s138_s1, %s87_s22  ;;  %p91_p0 = scmp.lt.u32.totalorder %s87_s22, %s138_s1 }
  0x22   :  { %p93_p1 = pnand %p91_p0, %p88_p13 }
  0x24   :  { %96 = shalt.err (!%p93_p1)
}
  0x25   :  { %45 = dma.vmem_to_hbm [thread:$0]  %s43_s19, 256, %s138_s1, [#allocation4]  }
  0x26   :  { %99 = dma.done.wait [#allocation4], 256  }
  0x27   :  { %100 = vsyncadd [#allocation4], 4294967040 }
  0x28   :  { %49 = vsyncpa [#allocation3], 1 }
  0x29   :  { %50 = vsyncpa [#allocation4], 1 }

</bundles_post_ra>
